<compile_context>
chip_gen: v6e
topology: v6e:2x2x1
jax: 0.10.0
libtpu: 0.0.40
codegen_flags: <defaults>
</compile_context>

<pallas_src>
import jax
import jax.numpy as jnp
from jax.experimental import pallas as pl
from jax.experimental.pallas import tpu as pltpu

INPUT_SIZE = 500
HIDDEN_SIZE = 100
OUTPUT_SIZE = 1

H_PAD = 128  # hidden dim 100 -> 128 (full vreg lanes; zero cols are inert)


def _round_up(n, m):
    return ((n + m - 1) // m) * m


def _choose_tile(batch, tile_b, row_align):
    """Pick a batch tile TB (multiple of row_align or == batch) and the grid size."""
    if batch <= row_align:
        return batch, 1                       # single full-array block
    if batch <= tile_b:
        # Split into >= 2 tiles so both v7x TensorCores get work.
        tb = _round_up(pl.cdiv(batch, 2), row_align)
        return tb, pl.cdiv(batch, tb)
    tb = _round_up(tile_b, row_align)
    return tb, pl.cdiv(batch, tb)


def mlp_kernel(x_ref, w1_ref, b1_ref, w2_ref, b2_ref, o_ref):
    # x_ref:  (TB, 500)   f32 or bf16 (streamed per grid step)
    # w1_ref: (500, 128)  f32 or bf16 (resident)
    # b1_ref: (1, 128)    f32 (resident)
    # w2_ref: (1, 128)    f32 (fc2 weight as a row, resident)
    # b2_ref: (1, 1)      f32 (resident)
    # o_ref:  (TB, 1)     f32
    h = jnp.dot(x_ref[...], w1_ref[...],
                preferred_element_type=jnp.float32) + b1_ref[...]        # MXU, (TB, 128)
    h = jnp.maximum(h, 0.0)                                              # ReLU on VPU
    # fc2 has N=1: broadcast-multiply on the VPU + lane reduce on the XLU
    # (both have slack while the MXU / DMA own the first matmul).
    o = jnp.sum(h * w2_ref[...], axis=-1, keepdims=True) + b2_ref[...]   # (TB, 1)
    o_ref[...] = jnp.tanh(o).astype(o_ref.dtype)                         # Tanh on EUP


def diagnostic_classifier(x, w1, b1, w2, b2, *, tile_b=1024):
    """x: (B, 500); w1: (500, 100); b1: (100,); w2: (100, 1); b2: (1,).
    Returns (B, 1) f32 = tanh(relu(x @ w1 + b1) @ w2 + b2)."""
    B, K = x.shape
    assert K == INPUT_SIZE

    # bf16 x packs 16 rows / vreg; f32 packs 8.
    row_align = 16 if x.dtype == jnp.bfloat16 else 8
    TB, num_tiles = _choose_tile(B, tile_b, row_align)

    # Match the resident weight dtype to the streamed activation dtype (accumulation
    # stays f32 via preferred_element_type).  Never cast x in the wrapper.
    w_dtype = jnp.bfloat16 if x.dtype == jnp.bfloat16 else jnp.float32

    # Resident (tiny) operands: pad hidden 100 -> 128.  Zero columns of W1 produce
    # zero hidden units, ReLU(0)=0, and the matching zero entries of w2_row contribute
    # nothing -> math unchanged.
    w1_p = (jnp.zeros((INPUT_SIZE, H_PAD), jnp.float32)
            .at[:, :HIDDEN_SIZE].set(w1.astype(jnp.float32))
            .astype(w_dtype))
    b1_p = jnp.zeros((1, H_PAD), jnp.float32).at[0, :HIDDEN_SIZE].set(b1)
    w2_row = jnp.zeros((1, H_PAD), jnp.float32).at[0, :HIDDEN_SIZE].set(w2[:, 0])
    b2_p = b2.reshape(1, OUTPUT_SIZE).astype(jnp.float32)

    x_item = x.dtype.itemsize
    w_item = jnp.dtype(w_dtype).itemsize
    x_bytes = B * INPUT_SIZE * x_item
    w_bytes = INPUT_SIZE * H_PAD * w_item + (2 * H_PAD + 1) * 4
    out_bytes = B * OUTPUT_SIZE * 4

    # VMEM footprint: x + out double-buffered per step, weights double-buffered once.
    vmem_needed = (2 * TB * INPUT_SIZE * x_item
                   + 2 * (INPUT_SIZE * H_PAD * w_item + (2 * H_PAD + 1) * 4)
                   + 2 * TB * OUTPUT_SIZE * 4)
    compiler_kwargs = dict(dimension_semantics=("parallel",))
    if vmem_needed > 12 * 1024 * 1024:
        # v5e's scoped-VMEM default is 16 MiB; raise it when a large tile is requested.
        compiler_kwargs["vmem_limit_bytes"] = int(vmem_needed + 4 * 1024 * 1024)

    out = pl.pallas_call(
        mlp_kernel,
        out_shape=jax.ShapeDtypeStruct((B, OUTPUT_SIZE), jnp.float32),
        grid_spec=pltpu.PrefetchScalarGridSpec(
            num_scalar_prefetch=0,
            grid=(num_tiles,),
            in_specs=[
                pl.BlockSpec((TB, INPUT_SIZE), lambda i: (i, 0)),      # x: streamed, unpadded
                pl.BlockSpec((INPUT_SIZE, H_PAD), lambda i: (0, 0)),   # W1: resident
                pl.BlockSpec((1, H_PAD), lambda i: (0, 0)),            # b1: resident
                pl.BlockSpec((1, H_PAD), lambda i: (0, 0)),            # w2 row: resident
                pl.BlockSpec((1, OUTPUT_SIZE), lambda i: (0, 0)),      # b2: resident
            ],
            out_specs=pl.BlockSpec((TB, OUTPUT_SIZE), lambda i: (i, 0)),
        ),
        compiler_params=pltpu.CompilerParams(**compiler_kwargs),
        cost_estimate=pl.CostEstimate(
            flops=2 * B * INPUT_SIZE * H_PAD + 2 * B * H_PAD,
            transcendentals=B,
            bytes_accessed=x_bytes + w_bytes + out_bytes,
        ),
    )(x, w1_p, b1_p, w2_row, b2_p)
    return out


def init_params(key):
    # Deterministic init mimicking nn.Linear: U(-1/sqrt(fan_in), 1/sqrt(fan_in)).
    k1, k2, k3, k4 = jax.random.split(key, 4)
    lim1 = 1.0 / jnp.sqrt(jnp.float32(INPUT_SIZE))
    lim2 = 1.0 / jnp.sqrt(jnp.float32(HIDDEN_SIZE))
    w1 = jax.random.uniform(k1, (INPUT_SIZE, HIDDEN_SIZE), jnp.float32, -lim1, lim1)
    b1 = jax.random.uniform(k2, (HIDDEN_SIZE,), jnp.float32, -lim1, lim1)
    w2 = jax.random.uniform(k3, (HIDDEN_SIZE, OUTPUT_SIZE), jnp.float32, -lim2, lim2)
    b2 = jax.random.uniform(k4, (OUTPUT_SIZE,), jnp.float32, -lim2, lim2)
    return w1, b1, w2, b2


if __name__ == "__main__":
    key = jax.random.PRNGKey(0)
    kx, kp = jax.random.split(key)
    w1, b1, w2, b2 = init_params(kp)

    # Small aligned batch (single full-array block).
    B = 8
    x = jax.random.normal(kx, (B, INPUT_SIZE), jnp.float32)
    ref = jnp.tanh(jnp.maximum(x @ w1 + b1, 0.0) @ w2 + b2)
    out = jax.block_until_ready(diagnostic_classifier(x, w1, b1, w2, b2))
    assert out.shape == (B, OUTPUT_SIZE)
    # Tolerance covers possible differences between Mosaic's and XLA's default
    # f32 MXU matmul precision (bf16-pass based); typical error is far smaller.
    assert jnp.allclose(out, ref, atol=1e-2, rtol=1e-2), float(jnp.max(jnp.abs(out - ref)))

    # Ragged batch: exercises the 2-tile grid and the partial last tile (masked stores).
    B2 = 13
    x2 = jax.random.normal(kx, (B2, INPUT_SIZE), jnp.float32)
    ref2 = jnp.tanh(jnp.maximum(x2 @ w1 + b1, 0.0) @ w2 + b2)
    out2 = jax.block_until_ready(diagnostic_classifier(x2, w1, b1, w2, b2))
    assert out2.shape == (B2, OUTPUT_SIZE)
    assert jnp.allclose(out2, ref2, atol=1e-2, rtol=1e-2), float(jnp.max(jnp.abs(out2 - ref2)))

    print("KERNEL_OK")
</pallas_src>

<mosaic_0001>
module attributes {stable_mosaic.version = 11 : i64} {
  func.func @mlp_kernel(%arg0: i32, %arg1: memref<8x500xf32, #tpu.memory_space<vmem>>, %arg2: memref<500x128xf32, #tpu.memory_space<vmem>>, %arg3: memref<1x128xf32, #tpu.memory_space<vmem>>, %arg4: memref<1x128xf32, #tpu.memory_space<vmem>>, %arg5: memref<1x1xf32, #tpu.memory_space<vmem>>, %arg6: memref<8x1xf32, #tpu.memory_space<vmem>>) attributes {dimension_semantics = [#tpu.dimension_semantics<parallel>], iteration_bounds = array<i64: 1>, scalar_prefetch = 0 : i64, scratch_operands = 0 : i64, tpu.core_type = #tpu.core_type<tc>, window_params = [{transform_indices = @transform_0, window_bounds = array<i64: 8, 500>}, {pipeline_mode = #tpu.pipeline_mode<synchronous>, transform_indices = @transform_1, window_bounds = array<i64: 500, 128>}, {pipeline_mode = #tpu.pipeline_mode<synchronous>, transform_indices = @transform_2, window_bounds = array<i64: 1, 128>}, {pipeline_mode = #tpu.pipeline_mode<synchronous>, transform_indices = @transform_3, window_bounds = array<i64: 1, 128>}, {pipeline_mode = #tpu.pipeline_mode<synchronous>, transform_indices = @transform_4, window_bounds = array<i64: 1, 1>}, {transform_indices = @transform_5, window_bounds = array<i64: 8, 1>}]} {
    %c0 = arith.constant 0 : index
    %c0_0 = arith.constant 0 : index
    %0 = vector.load %arg1[%c0, %c0_0] : memref<8x500xf32, #tpu.memory_space<vmem>>, vector<8x500xf32>
    %c0_1 = arith.constant 0 : index
    %c0_2 = arith.constant 0 : index
    %1 = vector.load %arg2[%c0_1, %c0_2] : memref<500x128xf32, #tpu.memory_space<vmem>>, vector<500x128xf32>
    %cst = arith.constant dense<0.000000e+00> : vector<8x128xf32>
    %2 = tpu.matmul %0, %1, %cst {dimension_numbers = #tpu.dot_dimension_numbers<[1], [0], [0], [1], [0, 0, 1, 1], [], []>} : vector<8x500xf32>, vector<500x128xf32>, vector<8x128xf32> -> vector<8x128xf32>
    %c0_3 = arith.constant 0 : index
    %c0_4 = arith.constant 0 : index
    %3 = vector.load %arg3[%c0_3, %c0_4] : memref<1x128xf32, #tpu.memory_space<vmem>>, vector<1x128xf32>
    %4 = vector.broadcast %3 : vector<1x128xf32> to vector<8x128xf32>
    %5 = arith.addf %2, %4 : vector<8x128xf32>
    %cst_5 = arith.constant 0.000000e+00 : f32
    %6 = vector.broadcast %cst_5 : f32 to vector<8x128xf32>
    %7 = arith.maximumf %5, %6 : vector<8x128xf32>
    %c0_6 = arith.constant 0 : index
    %c0_7 = arith.constant 0 : index
    %8 = vector.load %arg4[%c0_6, %c0_7] : memref<1x128xf32, #tpu.memory_space<vmem>>, vector<1x128xf32>
    %9 = vector.broadcast %8 : vector<1x128xf32> to vector<8x128xf32>
    %10 = arith.mulf %7, %9 : vector<8x128xf32>
    %cst_8 = arith.constant dense<0.000000e+00> : vector<8xf32>
    %11 = vector.multi_reduction <add>, %10, %cst_8 [1] : vector<8x128xf32> to vector<8xf32>
    %12 = vector.shape_cast %11 : vector<8xf32> to vector<8x1xf32>
    %c0_9 = arith.constant 0 : index
    %c0_10 = arith.constant 0 : index
    %13 = vector.load %arg5[%c0_9, %c0_10] : memref<1x1xf32, #tpu.memory_space<vmem>>, vector<1x1xf32>
    %14 = vector.broadcast %13 : vector<1x1xf32> to vector<8x1xf32>
    %15 = arith.addf %12, %14 : vector<8x1xf32>
    %16 = math.tanh %15 : vector<8x1xf32>
    %c0_11 = arith.constant 0 : index
    %c0_12 = arith.constant 0 : index
    %17 = vector.load %arg6[%c0_11, %c0_12] : memref<8x1xf32, #tpu.memory_space<vmem>>, vector<8x1xf32>
    tpu.vector_store %arg6[%c0_11, %c0_12], %16 {strides = array<i32>} : memref<8x1xf32, #tpu.memory_space<vmem>>, vector<8x1xf32>,
    return
  }
  func.func @transform_0(%arg0: i32) -> (i32, i32) {
    %c0_i32 = arith.constant 0 : i32
    %c0_i32_0 = arith.constant 0 : i32
    return %arg0, %c0_i32 : i32, i32
  }
  func.func @transform_1(%arg0: i32) -> (i32, i32) {
    %c0_i32 = arith.constant 0 : i32
    %c0_i32_0 = arith.constant 0 : i32
    %c0_i32_1 = arith.constant 0 : i32
    return %c0_i32, %c0_i32_0 : i32, i32
  }
  func.func @transform_2(%arg0: i32) -> (i32, i32) {
    %c0_i32 = arith.constant 0 : i32
    %c0_i32_0 = arith.constant 0 : i32
    %c0_i32_1 = arith.constant 0 : i32
    return %c0_i32, %c0_i32_0 : i32, i32
  }
  func.func @transform_3(%arg0: i32) -> (i32, i32) {
    %c0_i32 = arith.constant 0 : i32
    %c0_i32_0 = arith.constant 0 : i32
    %c0_i32_1 = arith.constant 0 : i32
    return %c0_i32, %c0_i32_0 : i32, i32
  }
  func.func @transform_4(%arg0: i32) -> (i32, i32) {
    %c0_i32 = arith.constant 0 : i32
    %c0_i32_0 = arith.constant 0 : i32
    %c0_i32_1 = arith.constant 0 : i32
    return %c0_i32, %c0_i32_0 : i32, i32
  }
  func.func @transform_5(%arg0: i32) -> (i32, i32) {
    %c0_i32 = arith.constant 0 : i32
    %c0_i32_0 = arith.constant 0 : i32
    return %arg0, %c0_i32 : i32, i32
  }
}

</mosaic_0001>

<bundles_post_ra>
// kernel: tpu_custom_call.1
= control target key start
LH: loop header
LB: loop body
LE: loop exit
PB: predicated region body
PF: predicated region fallthrough
CT: control target
= control target key end

     0   :  { %s473_s0 = inlined_call_operand.hbm [shape: f32[8,500], index: 0, kind: input, shape index: {}]   ;;  %s474_s1 = inlined_call_operand.hbm [shape: f32[500,128], index: 1, kind: input, shape index: {}]   ;;  %s475_s2 = inlined_call_operand.vmem [shape: f32[1,128], index: 2, kind: input, shape index: {}]   ;;  %s476_s3 = inlined_call_operand.vmem [shape: f32[1,128], index: 3, kind: input, shape index: {}]   ;;  %s477_s4 = inlined_call_operand.<no memory space> [shape: f32[1,1], index: 4, kind: input, shape index: {}]   ;;  %s478_s5 = inlined_call_operand.vmem [shape: f32[8,1], index: 5, kind: output, shape index: {}]  }
   0x1   :  { %v10_v0 = vstv %s477_s4 }
   0x2   :  { %11 = vst [vmem:[#allocation2] sm:$0x1] %v10_v0 }
   0x3   :  { %12 = vsyncpa [#allocation4], 0 }
   0x4   :  { %13 = vsyncpa [#allocation6], 0  ;;  %s389_s20 = smov [#allocation3]   ;;  %s390_s22 = smov [#allocation5]  }
   0x5   :  { %s20_s21 = sshll.u32 %s389_s20, 4  ;;  %s29_s23 = sshll.u32 %s390_s22, 4  ;;  %s21_s21 = int_to_ptr.vmem [resolvable:$true] %s20_s21  ;;  %s30_s23 = int_to_ptr.vmem [resolvable:$true] %s29_s23 }
   0x6   :  { %s353_s24 = scalar_lea.vmem %s21_s21, 512  ;;  %p358_p1 = scmp.lt.s32.totalorder %s21_s21, %s21_s21 }
   0x7   :  { %p354_p0 = scmp.ne.s32.totalorder %s21_s21, %s353_s24  ;;  %p359_p2 = scmp.lt.s32.totalorder %s353_s24, %s353_s24 }
   0x9   :  { %p360_p3 = por %p359_p2, %p358_p1 }
   0xb   :  { %p361_p4 = pnand %p360_p3, %p354_p0 }
   0xd   :  { %364 = shalt.err (!%p361_p4)
}
   0xe   :  { %23 = dma.hbm_to_vmem [thread:$0]  %s473_s0, 512, %s21_s21, [#allocation4]  }
   0xf   :  { %s373_s4 = scalar_lea.vmem %s30_s23, 8064  ;;  %p378_p6 = scmp.lt.s32.totalorder %s30_s23, %s30_s23 }
  0x10   :  { %p374_p5 = scmp.ne.s32.totalorder %s30_s23, %s373_s4  ;;  %p379_p7 = scmp.lt.s32.totalorder %s373_s4, %s373_s4 }
  0x12   :  { %p380_p8 = por %p379_p7, %p378_p6 }
  0x14   :  { %p381_p9 = pnand %p380_p8, %p374_p5 }
  0x16   :  { %384 = shalt.err (!%p381_p9)
}
  0x17   :  { %s391_s27 = smov 128   ;;  %s392_s28 = smov 8  }
  0x18   :  { %35 = dma.hbm_to_vmem [thread:$0]  %s474_s1, 8064, %s30_s23, [#allocation6], %s391_s27, %s391_s27, %s392_s28  }
  0x19   :  { %385 = dma.done.wait [#allocation4], 512  }
  0x1a   :  { %386 = vsyncadd [#allocation4], 4294966784 }
  0x1b   :  { %387 = dma.done.wait [#allocation6], 8064  }
  0x1c   :  { %388 = vsyncadd [#allocation6], 4294959232  ;;  %v393_v1 = vmov 0.0   ;;  %v99_v2 = vld [vmem:[#allocation5 + $0x178] sm:$0xff]  ;;  %v98_v3 = vld [vmem:[#allocation5 + $0x170] sm:$0xff]  ;;  %vm126_vm0 = vcmask 1043456  }
  0x1d   :  { %200 = vmatprep.subr.mxu1 %v393_v1  ;;  %v97_v4 = vld [vmem:[#allocation5 + $0x168] sm:$0xff]  ;;  %v83_v5 = vld [vmem:[#allocation5 + $0xf8] sm:$0xff]  ;;  %v96_v6 = vld [vmem:[#allocation5 + $0x160] sm:$0xff]  ;;  %vm122_vm1 = vcmask 949248   ;;  %vm290_vm2 = vcmask 7168  }
  0x1e   :  { %201 = vmatpush1.msra.mxu1 %v99_v2  ;;  %303 = vmatprep.subr.mxu0 %v83_v5  ;;  %v67_v7 = vld [vmem:[#allocation5 + $0x78] sm:$0xff]  ;;  %v82_v8 = vld [vmem:[#allocation5 + $0xf0] sm:$0xff]  ;;  %v81_v10 = vld [vmem:[#allocation5 + $0xe8] sm:$0xff] }
  0x1f   :  { %202 = vmatprep.subr.mxu1 %v393_v1  ;;  %304 = vmatpush3.msra.mxu0 %v67_v7  ;;  %v66_v9 = vld [vmem:[#allocation5 + $0x70] sm:$0xff]  ;;  %v95_v11 = vld [vmem:[#allocation5 + $0x158] sm:$0xff]  ;;  %v65_v12 = vld [vmem:[#allocation5 + $0x68] sm:$0xff] }
  0x20   :  { %203 = vmatpush1.msra.mxu1 %v98_v3  ;;  %305 = vmatprep.subr.mxu0 %v82_v8  ;;  %v80_v13 = vld [vmem:[#allocation5 + $0xe0] sm:$0xff]  ;;  %v94_v14 = vld [vmem:[#allocation5 + $0x150] sm:$0xff]  ;;  %v79_v16 = vld [vmem:[#allocation5 + $0xd8] sm:$0xff] }
  0x21   :  { %204 = vmatprep.subr.mxu1 %v393_v1  ;;  %306 = vmatpush3.msra.mxu0 %v66_v9  ;;  %v64_v15 = vld [vmem:[#allocation5 + $0x60] sm:$0xff]  ;;  %v93_v17 = vld [vmem:[#allocation5 + $0x148] sm:$0xff]  ;;  %v63_v18 = vld [vmem:[#allocation5 + $0x58] sm:$0xff] }
  0x22   :  { %205 = vmatpush1.msra.mxu1 %v97_v4  ;;  %307 = vmatprep.subr.mxu0 %v81_v10  ;;  %v78_v19 = vld [vmem:[#allocation5 + $0xd0] sm:$0xff]  ;;  %v92_v20 = vld [vmem:[#allocation5 + $0x140] sm:$0xff]  ;;  %v77_v22 = vld [vmem:[#allocation5 + $0xc8] sm:$0xff] }
  0x23   :  { %206 = vmatprep.subr.mxu1 %v393_v1  ;;  %308 = vmatpush3.msra.mxu0 %v65_v12  ;;  %v62_v21 = vld [vmem:[#allocation5 + $0x50] sm:$0xff]  ;;  %v91_v23 = vld [vmem:[#allocation5 + $0x138] sm:$0xff]  ;;  %v61_v24 = vld [vmem:[#allocation5 + $0x48] sm:$0xff] }
  0x24   :  { %207 = vmatpush1.msra.mxu1 %v96_v6  ;;  %309 = vmatprep.subr.mxu0 %v80_v13  ;;  %v76_v25 = vld [vmem:[#allocation5 + $0xc0] sm:$0xff]  ;;  %v90_v26 = vld [vmem:[#allocation5 + $0x130] sm:$0xff]  ;;  %v75_v28 = vld [vmem:[#allocation5 + $0xb8] sm:$0xff] }
  0x25   :  { %208 = vmatprep.subr.mxu1 %v393_v1  ;;  %310 = vmatpush3.msra.mxu0 %v64_v15  ;;  %v60_v27 = vld [vmem:[#allocation5 + $0x40] sm:$0xff]  ;;  %v89_v29 = vld [vmem:[#allocation5 + $0x128] sm:$0xff]  ;;  %v59_v30 = vld [vmem:[#allocation5 + $0x38] sm:$0xff] }
  0x26   :  { %209 = vmatpush1.msra.mxu1 %v95_v11  ;;  %311 = vmatprep.subr.mxu0 %v79_v16  ;;  %v74_v31 = vld [vmem:[#allocation5 + $0xb0] sm:$0xff]  ;;  %v88_v32 = vld [vmem:[#allocation5 + $0x120] sm:$0xff]  ;;  %v73_v34 = vld [vmem:[#allocation5 + $0xa8] sm:$0xff] }
  0x27   :  { %210 = vmatprep.subr.mxu1 %v393_v1  ;;  %312 = vmatpush3.msra.mxu0 %v63_v18  ;;  %v58_v33 = vld [vmem:[#allocation5 + $0x30] sm:$0xff]  ;;  %v87_v35 = vld [vmem:[#allocation5 + $0x118] sm:$0xff]  ;;  %v57_v36 = vld [vmem:[#allocation5 + $0x28] sm:$0xff] }
  0x28   :  { %211 = vmatpush1.msra.mxu1 %v94_v14  ;;  %313 = vmatprep.subr.mxu0 %v78_v19  ;;  %v72_v37 = vld [vmem:[#allocation5 + $0xa0] sm:$0xff]  ;;  %v86_v38 = vld [vmem:[#allocation5 + $0x110] sm:$0xff]  ;;  %v71_v40 = vld [vmem:[#allocation5 + $0x98] sm:$0xff] }
  0x29   :  { %212 = vmatprep.subr.mxu1 %v393_v1  ;;  %314 = vmatpush3.msra.mxu0 %v62_v21  ;;  %v56_v39 = vld [vmem:[#allocation5 + $0x20] sm:$0xff]  ;;  %v85_v41 = vld [vmem:[#allocation5 + $0x108] sm:$0xff]  ;;  %v55_v42 = vld [vmem:[#allocation5 + $0x18] sm:$0xff] }
  0x2a   :  { %213 = vmatpush1.msra.mxu1 %v93_v17  ;;  %315 = vmatprep.subr.mxu0 %v77_v22  ;;  %v70_v43 = vld [vmem:[#allocation5 + $0x90] sm:$0xff]  ;;  %v84_v44 = vld [vmem:[#allocation5 + $0x100] sm:$0xff]  ;;  %v69_v46 = vld [vmem:[#allocation5 + $0x88] sm:$0xff] }
  0x2b   :  { %214 = vmatprep.subr.mxu1 %v393_v1  ;;  %316 = vmatpush3.msra.mxu0 %v61_v24  ;;  %v54_v45 = vld [vmem:[#allocation5 + $0x10] sm:$0xff]  ;;  %v53_v48 = vld [vmem:[#allocation5 + $0x8] sm:$0xff]  ;;  %v68_v49 = vld [vmem:[#allocation5 + $0x80] sm:$0xff] }
  0x2c   :  { %215 = vmatpush1.msra.mxu1 %v92_v20  ;;  %317 = vmatprep.subr.mxu0 %v76_v25  ;;  %v114_v47 = vld [vmem:[#allocation5 + $0x1f0] sm:$0xf]  ;;  %v113_v50 = vld [vmem:[#allocation5 + $0x1e8] sm:$0xff]  ;;  %v52_v51 = vld [vmem:[#allocation5] sm:$0xff] }
  0x2d   :  { %216 = vmatprep.subr.mxu1 %v393_v1  ;;  %318 = vmatpush3.msra.mxu0 %v60_v27  ;;  %v49_v52 = vld [vmem:[#allocation3 + $0x8] sm:$0xff]  ;;  %v112_v53 = vld [vmem:[#allocation5 + $0x1e0] sm:$0xff]  ;;  %v51_v55 = vld [vmem:[#allocation3 + $0x18] sm:$0xff] }
  0x2e   :  { %217 = vmatpush1.msra.mxu1 %v91_v23  ;;  %319 = vmatprep.subr.mxu0 %v75_v28  ;;  %v48_v54 = vld [vmem:[#allocation3] sm:$0xff]  ;;  %v111_v56 = vld [vmem:[#allocation5 + $0x1d8] sm:$0xff]  ;;  %v110_v57 = vld [vmem:[#allocation5 + $0x1d0] sm:$0xff] }
  0x2f   :  { %218 = vmatprep.subr.mxu1 %v393_v1  ;;  %320 = vmatpush3.msra.mxu0 %v59_v30  ;;  %v109_v58 = vld [vmem:[#allocation5 + $0x1c8] sm:$0xff]  ;;  %v108_v59 = vld [vmem:[#allocation5 + $0x1c0] sm:$0xff]  ;;  %v107_v60 = vld [vmem:[#allocation5 + $0x1b8] sm:$0xff] }
  0x30   :  { %219 = vmatpush1.msra.mxu1 %v90_v26  ;;  %321 = vmatprep.subr.mxu0 %v74_v31  ;;  %v106_v61 = vld [vmem:[#allocation5 + $0x1b0] sm:$0xff]  ;;  %v105_v62 = vld [vmem:[#allocation5 + $0x1a8] sm:$0xff]  ;;  %v104_v63 = vld [vmem:[#allocation5 + $0x1a0] sm:$0xff] }
  0x31   :  { %220 = vmatprep.subr.mxu1 %v393_v1  ;;  %322 = vmatpush3.msra.mxu0 %v58_v33  ;;  %v103_v0 = vld [vmem:[#allocation5 + $0x198] sm:$0xff]  ;;  %v102_v2 = vld [vmem:[#allocation5 + $0x190] sm:$0xff]  ;;  %v101_v3 = vld [vmem:[#allocation5 + $0x188] sm:$0xff] }
  0x32   :  { %221 = vmatpush1.msra.mxu1 %v89_v29  ;;  %323 = vmatprep.subr.mxu0 %v73_v34  ;;  %v100_v4 = vld [vmem:[#allocation5 + $0x180] sm:$0xff]  ;;  %v50_v5 = vld [vmem:[#allocation3 + $0x10] sm:$0xff]  ;;  %v298_v9 = vld [vmem:[%s475_s2] ss:$0 sm:$0xff] }
  0x33   :  { %222 = vmatprep.subr.mxu1 %v393_v1  ;;  %324 = vmatpush3.msra.mxu0 %v57_v36  ;;  %v301_v14 = vld [vmem:[%s476_s3] ss:$0 sm:$0xff] }
  0x34   :  { %223 = vmatpush1.msra.mxu1 %v88_v32  ;;  %325 = vmatprep.subr.mxu0 %v72_v37 }
  0x35   :  { %224 = vmatprep.subr.mxu1 %v393_v1  ;;  %326 = vmatpush3.msra.mxu0 %v56_v39 }
  0x36   :  { %225 = vmatpush1.msra.mxu1 %v87_v35  ;;  %327 = vmatprep.subr.mxu0 %v71_v40 }
  0x37   :  { %226 = vmatprep.subr.mxu1 %v393_v1  ;;  %328 = vmatpush3.msra.mxu0 %v55_v42 }
  0x38   :  { %227 = vmatpush1.msra.mxu1 %v86_v38  ;;  %329 = vmatprep.subr.mxu0 %v70_v43 }
  0x39   :  { %228 = vmatprep.subr.mxu1 %v393_v1  ;;  %330 = vmatpush3.msra.mxu0 %v54_v45 }
  0x3a   :  { %229 = vmatpush1.msra.mxu1 %v85_v41  ;;  %331 = vmatprep.subr.mxu0 %v69_v46 }
  0x3b   :  { %230 = vmatprep.subr.mxu1 %v393_v1  ;;  %332 = vmatpush3.msra.mxu0 %v53_v48 }
  0x3c   :  { %231 = vmatpush1.msra.mxu1 %v84_v44  ;;  %333 = vmatprep.subr.mxu0 %v68_v49 }
  0x3d   :  { %234 = vmatprep.subr.mxu1 %v393_v1  ;;  %334 = vmatpush3.msra.mxu0 %v52_v51 }
  0x3e   :  { %299 = vmatpush2.msk.msra.mxu1 %vm126_vm0, %v114_v47  ;;  %194 = vmatprep.mubr.f32.mxu0 %v49_v52 }
  0x3f   :  { %236 = vmatprep.subr.mxu1 %v393_v1  ;;  %195 = vmatmul.mubr.f32.vlgmr.msra.gmra.mxu0 %v48_v54 }
  0x40   :  { %237 = vmatpush2.msra.mxu1 %v113_v50  ;;  %300 = vmatprep.mubr.msk.f32.mxu1 %vm122_vm1, %v51_v55 }
  0x41   :  { %238 = vmatprep.subr.mxu1 %v393_v1 }
  0x42   :  { %239 = vmatpush2.msra.mxu1 %v112_v53 }
  0x43   :  { %240 = vmatprep.subr.mxu1 %v393_v1 }
  0x44   :  { %241 = vmatpush2.msra.mxu1 %v111_v56 }
  0x45   :  { %242 = vmatprep.subr.mxu1 %v393_v1 }
  0x46   :  { %243 = vmatpush2.msra.mxu1 %v110_v57 }
  0x47   :  { %244 = vmatprep.subr.mxu1 %v393_v1 }
  0x48   :  { %245 = vmatpush2.msra.mxu1 %v109_v58 }
  0x49   :  { %246 = vmatprep.subr.mxu1 %v393_v1 }
  0x4a   :  { %247 = vmatpush2.msra.mxu1 %v108_v59 }
  0x4b   :  { %248 = vmatprep.subr.mxu1 %v393_v1 }
  0x4c   :  { %249 = vmatpush2.msra.mxu1 %v107_v60 }
  0x4d   :  { %250 = vmatprep.subr.mxu1 %v393_v1 }
  0x4e   :  { %251 = vmatpush2.msra.mxu1 %v106_v61 }
  0x4f   :  { %252 = vmatprep.subr.mxu1 %v393_v1 }
  0x50   :  { %253 = vmatpush2.msra.mxu1 %v105_v62 }
  0x51   :  { %254 = vmatprep.subr.mxu1 %v393_v1 }
  0x52   :  { %255 = vmatpush2.msra.mxu1 %v104_v63 }
  0x53   :  { %256 = vmatprep.subr.mxu1 %v393_v1 }
  0x54   :  { %257 = vmatpush2.msra.mxu1 %v103_v0 }
  0x55   :  { %258 = vmatprep.subr.mxu1 %v393_v1 }
  0x56   :  { %259 = vmatpush2.msra.mxu1 %v102_v2 }
  0x57   :  { %260 = vmatprep.subr.mxu1 %v393_v1 }
  0x58   :  { %261 = vmatpush2.msra.mxu1 %v101_v3 }
  0x59   :  { %262 = vmatprep.subr.mxu1 %v393_v1  ;;  %v302_v1 = vld [vmem:[#allocation2] ss:$0 sm:$0xff] }
  0x5a   :  { %263 = vmatpush2.msra.mxu1 %v100_v4 }
  0x5b   :  { %265 = vmatmul.mubr.f32.vlgmr.msra.gmra.mxu1 %v50_v5 }
  0xff   :  { %v335_v6 = vpop.f32.mrf.mxu0 }
 0x101   :  { %v336_v7 = vpop.f32.mrf.mxu0 }
 0x102   :  { %v337_v8 = vadd.f32 %v336_v7, %v335_v6 }
 0x104   :  { %v197_v10 = vadd.f32 %v337_v8, %v298_v9 }
 0x11b   :  { %v266_v11 = vpop.f32.mrf.mxu1 }
 0x11c   :  { %v267_v12 = vadd.f32 %v266_v11, %v197_v10 }
 0x11d   :  { %v268_v13 = vpop.f32.mrf.mxu1 }
 0x11e   :  { %v270_v15 = vmax.f32 %v267_v12, 0.0 }
 0x120   :  { %v278_v16 = vmul.f32 %v301_v14, %v270_v15 }
 0x122   :  { %279 = vadd.xlane.f32.xlu0 %v278_v16 }
 0x1ab   :  { %v280_v17 = vpop.xlane.xlu0 %279 }
 0x1ac   :  { %v288_v18 = vadd.f32 %v302_v1, %v280_v17 }
 0x1ae   :  { %343 = vtanh.f32 %v288_v18 }
 0x1bb   :  { %v344_v19 = vpop.eup %343 }
 0x1bc   :  { %291 = vst.msk [vmem:[%s478_s5] sm:$0xff] %vm290_vm2, %v344_v19 }
 0x1bd   :  { %296 = vsyncpa [#allocation4], 1 }
 0x1be   :  { %297 = vsyncpa [#allocation6], 1 }

</bundles_post_ra>
